<compile_context>
chip_gen: v7x
topology: tpu7x:2x2x1
jax: 0.10.0
libtpu: 0.0.40
codegen_flags: <defaults>
</compile_context>

<pallas_src>
import functools

import jax
import jax.numpy as jnp
from jax import lax
from jax.experimental import pallas as pl
from jax.experimental.pallas import tpu as pltpu


def _round_up(x, m):
    return ((x + m - 1) // m) * m


def bilstm_kernel(emb_ref, mask_ref, wih_ref, whh_ref, b_ref, wtag_ref, btag_ref,
                  out_ref, h_scr, *, T, Bp, Hh, matmul_dtype):
    """Fused bidirectional LSTM + mask + hidden2tag.

    emb_ref : (T*Bp, 2E)  lane-fused embeddings; row (t, b) = [emb(x[b,t]) | emb(x[b,T-1-t])]
    mask_ref: (T*Bp, 1)   per-(t, b) mask.
    wih_ref : (2E, 8*Hh)  block-diagonal input weights, gate cols permuted to
                          [i_f,i_b, f_f,f_b, o_f,o_b, g_f,g_b].
    whh_ref : (2Hh, 8*Hh) block-diagonal recurrent weights, same column order.
    b_ref   : (1, 8*Hh)   summed biases, same column order.
    wtag_ref: (2Hh, Kpad) stacked hidden2tag weight ([fwd rows; bwd rows]).
    btag_ref: (1, Kpad)
    out_ref : (T*Bp, Kpad) lane-dense logits.
    h_scr   : (T*Bp, 2Hh)  time-aligned hidden stash, fwd lanes [:Hh], bwd lanes [Hh:].
    """
    mm = matmul_dtype
    H2 = 2 * Hh      # fused hidden width (fwd | bwd)
    G6 = 6 * Hh      # contiguous sigmoid block (i_f,i_b,f_f,f_b,o_f,o_b)

    # ---- Stage 1: hoisted input projection — ONE lane-dense matmul covers both
    #      directions and all timesteps. Kept as a value (vreg-resident); sliced
    #      statically inside the unrolled loop (no VMEM round trip).
    xp = (jnp.dot(emb_ref[...].astype(mm), wih_ref[...].astype(mm),
                  preferred_element_type=jnp.float32)
          + b_ref[...])                                              # (T*Bp, 8Hh) f32

    whh = whh_ref[...].astype(mm)                                    # (2Hh, 8Hh), hoisted

    h = jnp.zeros((Bp, H2), jnp.float32)
    c = jnp.zeros((Bp, H2), jnp.float32)

    # ---- Stage 2: fused fwd+bwd recurrence — one sub-tile MXU push per step,
    #      2 gate EUP pushes (sigmoid block + tanh block) + tanh(c), no select,
    #      no lane shift of a 4Hh block. NOTE: h_t -> h_{t+1} is a true data
    #      dependency; the full unroll (static Python loop, small fixed T) only
    #      gives the scheduler the scratch stores / address math to overlap.
    for s in range(T):
        pre = xp[s * Bp:(s + 1) * Bp, :] + jnp.dot(
            h.astype(mm), whh, preferred_element_type=jnp.float32)   # (Bp, 8Hh)
        sig = jax.nn.sigmoid(pre[:, :G6])     # [i_f,i_b | f_f,f_b | o_f,o_b]
        g_g = jnp.tanh(pre[:, G6:])           # [g_f | g_b]
        i_g = sig[:, 0:H2]
        f_g = sig[:, H2:2 * H2]
        o_g = sig[:, 2 * H2:3 * H2]
        c = f_g * c + i_g * g_g
        h = o_g * jnp.tanh(c)
        # Time-aligned stashes (8-sublane-aligned static row offsets, Bp % 8 == 0):
        # fwd hidden of step s is time s; bwd hidden of step s is time T-1-s.
        h_scr[s * Bp:(s + 1) * Bp, 0:Hh] = h[:, 0:Hh]
        h_scr[(T - 1 - s) * Bp:(T - s) * Bp, Hh:H2] = h[:, Hh:]

    # ---- Stage 3: ONE stacked hidden2tag matmul on the merged scratch, then
    #      mask (per-(t,b) scalar, so mask-then-linear == mask*(h@W) + bias;
    #      padded timesteps emit the bias, matching PyTorch) and lane-dense store.
    acc = jnp.dot(h_scr[...].astype(mm), wtag_ref[...].astype(mm),
                  preferred_element_type=jnp.float32)                # (T*Bp, Kpad)
    out_ref[...] = mask_ref[...] * acc + btag_ref[...]


def _fuse_params(params, Hh, E, tag_size, Kpad):
    """One-time wrapper-side weight fusion / permutation / padding (plain JAX)."""
    # PyTorch per-direction gate order is [i, f, g, o]; fused source column blocks
    # are [i_f, f_f, g_f, o_f, i_b, f_b, g_b, o_b].  Target lane order:
    # [i_f, i_b, f_f, f_b, o_f, o_b, g_f, g_b]  -> source block indices below.
    src_blocks = [0, 4, 1, 5, 3, 7, 2, 6]
    perm = jnp.concatenate([jnp.arange(Hh) + blk * Hh for blk in src_blocks])

    wih_full = jnp.zeros((2 * E, 8 * Hh), jnp.float32)
    wih_full = wih_full.at[:E, :4 * Hh].set(params["wih_f"])
    wih_full = wih_full.at[E:, 4 * Hh:].set(params["wih_b"])
    wih_bd = wih_full[:, perm]                                       # (2E, 8Hh)

    whh_full = jnp.zeros((2 * Hh, 8 * Hh), jnp.float32)
    whh_full = whh_full.at[:Hh, :4 * Hh].set(params["whh_f"])
    whh_full = whh_full.at[Hh:, 4 * Hh:].set(params["whh_b"])
    whh_bd = whh_full[:, perm]                                       # (2Hh, 8Hh)

    b_perm = jnp.concatenate([params["b_f"], params["b_b"]], axis=1)[:, perm]  # (1, 8Hh)

    wtag_p = jnp.zeros((2 * Hh, Kpad), jnp.float32).at[:, :tag_size].set(params["wtag"])
    btag_p = jnp.zeros((1, Kpad), jnp.float32).at[:, :tag_size].set(params["btag"])
    return wih_bd, whh_bd, b_perm, wtag_p, btag_p


def nerlstm_forward(x_ids, mask, params, *, matmul_dtype=jnp.bfloat16):
    """x_ids: (B, T) int32 token ids; mask: (B, T) float. Returns (B, T, tag_size)."""
    B, T = x_ids.shape
    E = params["embed"].shape[1]
    Hh = params["whh_f"].shape[0]
    tag_size = params["wtag"].shape[1]
    Kpad = _round_up(tag_size, 128)
    Bp = _round_up(B, 8)            # 8-sublane-aligned per-step row block

    wih_bd, whh_bd, b_perm, wtag_p, btag_p = _fuse_params(params, Hh, E, tag_size, Kpad)

    # Pad batch; padded rows run an independent (discarded) recurrence.
    x_pad = jnp.zeros((Bp, T), x_ids.dtype).at[:B].set(x_ids)
    m_pad = jnp.zeros((Bp, T), jnp.float32).at[:B].set(mask.astype(jnp.float32))

    # Gather embeddings directly into the lane-fused layout:
    # row (t, b) = [emb(x[b, t]) | emb(x[b, T-1-t])]  -> (T*Bp, 2E)
    emb_tm = jnp.take(params["embed"], x_pad.T, axis=0).astype(jnp.float32)  # (T, Bp, E)
    emb_fused = jnp.concatenate([emb_tm, emb_tm[::-1]], axis=-1).reshape(T * Bp, 2 * E)

    mask_flat = m_pad.T.reshape(T * Bp, 1)

    vmem = pl.BlockSpec(memory_space=pltpu.MemorySpace.VMEM)
    kernel = functools.partial(bilstm_kernel, T=T, Bp=Bp, Hh=Hh,
                               matmul_dtype=matmul_dtype)
    out_flat = pl.pallas_call(
        kernel,
        out_shape=jax.ShapeDtypeStruct((T * Bp, Kpad), jnp.float32),
        in_specs=[vmem] * 7,
        out_specs=vmem,
        scratch_shapes=[
            pltpu.VMEM((T * Bp, 2 * Hh), jnp.float32),   # merged time-aligned hidden
        ],
    )(emb_fused, mask_flat, wih_bd, whh_bd, b_perm, wtag_p, btag_p)

    out = out_flat.reshape(T, Bp, Kpad)[:, :B, :tag_size]
    return jnp.transpose(out, (1, 0, 2))                             # (B, T, tag)


def nerlstm_reference(x_ids, mask, params):
    """Pure-JAX reference (mirrors the PyTorch module) for correctness check."""
    B, T = x_ids.shape
    Hh = params["whh_f"].shape[0]
    emb = jnp.take(params["embed"], x_ids, axis=0).astype(jnp.float32)  # (B, T, E)
    xs = jnp.transpose(emb, (1, 0, 2))                                  # (T, B, E)

    def direction(wih, whh, b, seq):
        def step(carry, x_t):
            h, c = carry
            gates = x_t @ wih + h @ whh + b[0]
            i = jax.nn.sigmoid(gates[:, :Hh])
            f = jax.nn.sigmoid(gates[:, Hh:2 * Hh])
            g = jnp.tanh(gates[:, 2 * Hh:3 * Hh])
            o = jax.nn.sigmoid(gates[:, 3 * Hh:4 * Hh])
            c = f * c + i * g
            h = o * jnp.tanh(c)
            return (h, c), h
        h0 = jnp.zeros((B, Hh), jnp.float32)
        (_, _), hs = lax.scan(step, (h0, h0), seq)
        return hs                                                       # (T, B, Hh)

    hf = direction(params["wih_f"], params["whh_f"], params["b_f"], xs)
    hb = direction(params["wih_b"], params["whh_b"], params["b_b"], xs[::-1])[::-1]
    hcat = jnp.concatenate([hf, hb], axis=-1)                           # (T, B, H)
    out = hcat * mask.T[:, :, None]
    out = out @ params["wtag"] + params["btag"][0]
    return jnp.transpose(out, (1, 0, 2))


def make_params(key, vocab_size, embedding_dim, hidden_dim, tag_size):
    Hh = hidden_dim // 2
    ks = jax.random.split(key, 12)
    scale = 1.0 / jnp.sqrt(Hh)

    def u(k, shape, s=0.1):
        return jax.random.uniform(k, shape, jnp.float32, -s, s)

    # PyTorch LSTM weights: weight_ih (4*Hh, E), weight_hh (4*Hh, Hh), two biases.
    # Stored transposed for right-matmul inside the kernel; biases pre-summed.
    params = {
        "embed": u(ks[0], (vocab_size, embedding_dim), 0.5),
        "wih_f": u(ks[1], (4 * Hh, embedding_dim), scale).T,
        "whh_f": u(ks[2], (4 * Hh, Hh), scale).T,
        "b_f": (u(ks[3], (4 * Hh,), scale) + u(ks[4], (4 * Hh,), scale)).reshape(1, 4 * Hh),
        "wih_b": u(ks[5], (4 * Hh, embedding_dim), scale).T,
        "whh_b": u(ks[6], (4 * Hh, Hh), scale).T,
        "b_b": (u(ks[7], (4 * Hh,), scale) + u(ks[8], (4 * Hh,), scale)).reshape(1, 4 * Hh),
        "wtag": u(ks[9], (tag_size, hidden_dim), 0.2).T,    # (H, tag_size)
        "btag": u(ks[10], (tag_size,), 0.2).reshape(1, tag_size),
    }
    return {k: jnp.asarray(v, jnp.float32) for k, v in params.items()}


if __name__ == "__main__":
    # Small config consistent with the module: vocab=50, E=32, H=32 (16 per dir), 5 tags.
    vocab_size, embedding_dim, hidden_dim, tag_size = 50, 32, 32, 5
    B, T = 2, 8

    key = jax.random.PRNGKey(0)
    k_par, k_x = jax.random.split(key, 2)

    params = make_params(k_par, vocab_size, embedding_dim, hidden_dim, tag_size)
    x_ids = jax.random.randint(k_x, (B, T), 0, vocab_size, dtype=jnp.int32)
    lengths = jnp.array([T, T - 3], dtype=jnp.int32)
    mask = (jnp.arange(T)[None, :] < lengths[:, None]).astype(jnp.float32)   # (B, T)

    ref = nerlstm_reference(x_ids, mask, params)

    # Exact-parity path: f32 MXU operands.
    out_f32 = nerlstm_forward(x_ids, mask, params, matmul_dtype=jnp.float32)
    jax.block_until_ready(out_f32)
    assert out_f32.shape == (B, T, tag_size)
    err_f32 = float(jnp.max(jnp.abs(out_f32 - ref)))
    assert err_f32 < 5e-3, f"f32 max |kernel - reference| = {err_f32}"

    # Default fast path: bf16 MXU operands, f32 accumulation and gate math.
    out_bf16 = nerlstm_forward(x_ids, mask, params)
    jax.block_until_ready(out_bf16)
    assert out_bf16.shape == (B, T, tag_size)
    err_bf16 = float(jnp.max(jnp.abs(out_bf16 - ref)))
    assert err_bf16 < 5e-2, f"bf16 max |kernel - reference| = {err_bf16}"

    print("KERNEL_OK")
</pallas_src>

<mosaic_0001>
module attributes {stable_mosaic.version = 11 : i64} {
  func.func @bilstm_kernel(%arg0: memref<64x64xf32, #tpu.memory_space<vmem>>, %arg1: memref<64x1xf32, #tpu.memory_space<vmem>>, %arg2: memref<64x128xf32, #tpu.memory_space<vmem>>, %arg3: memref<32x128xf32, #tpu.memory_space<vmem>>, %arg4: memref<1x128xf32, #tpu.memory_space<vmem>>, %arg5: memref<32x128xf32, #tpu.memory_space<vmem>>, %arg6: memref<1x128xf32, #tpu.memory_space<vmem>>, %arg7: memref<64x128xf32, #tpu.memory_space<vmem>>, %arg8: memref<64x32xf32, #tpu.memory_space<vmem>>) attributes {dimension_semantics = [], scalar_prefetch = 0 : i64, scratch_operands = 1 : i64, tpu.core_type = #tpu.core_type<tc>} {
    %c0 = arith.constant 0 : index
    %c0_0 = arith.constant 0 : index
    %0 = vector.load %arg0[%c0, %c0_0] : memref<64x64xf32, #tpu.memory_space<vmem>>, vector<64x64xf32>
    %c0_1 = arith.constant 0 : index
    %c0_2 = arith.constant 0 : index
    %1 = vector.load %arg2[%c0_1, %c0_2] : memref<64x128xf32, #tpu.memory_space<vmem>>, vector<64x128xf32>
    %cst = arith.constant dense<0.000000e+00> : vector<64x128xf32>
    %2 = tpu.matmul %0, %1, %cst {dimension_numbers = #tpu.dot_dimension_numbers<[1], [0], [0], [1], [0, 0, 1, 1], [], []>} : vector<64x64xf32>, vector<64x128xf32>, vector<64x128xf32> -> vector<64x128xf32>
    %c0_3 = arith.constant 0 : index
    %c0_4 = arith.constant 0 : index
    %3 = vector.load %arg4[%c0_3, %c0_4] : memref<1x128xf32, #tpu.memory_space<vmem>>, vector<1x128xf32>
    %4 = vector.broadcast %3 : vector<1x128xf32> to vector<64x128xf32>
    %5 = arith.addf %2, %4 : vector<64x128xf32>
    %c0_5 = arith.constant 0 : index
    %c0_6 = arith.constant 0 : index
    %6 = vector.load %arg3[%c0_5, %c0_6] : memref<32x128xf32, #tpu.memory_space<vmem>>, vector<32x128xf32>
    %cst_7 = arith.constant 0.000000e+00 : f32
    %7 = vector.broadcast %cst_7 : f32 to vector<8x32xf32>
    %cst_8 = arith.constant 0.000000e+00 : f32
    %8 = vector.broadcast %cst_8 : f32 to vector<8x32xf32>
    %9 = vector.extract_strided_slice %5 {offsets = [0, 0], sizes = [8, 128], strides = [1, 1]} : vector<64x128xf32> to vector<8x128xf32>
    %cst_9 = arith.constant dense<0.000000e+00> : vector<8x128xf32>
    %10 = tpu.matmul %7, %6, %cst_9 {dimension_numbers = #tpu.dot_dimension_numbers<[1], [0], [0], [1], [0, 0, 1, 1], [], []>} : vector<8x32xf32>, vector<32x128xf32>, vector<8x128xf32> -> vector<8x128xf32>
    %11 = arith.addf %9, %10 : vector<8x128xf32>
    %12 = vector.extract_strided_slice %11 {offsets = [0, 0], sizes = [8, 96], strides = [1, 1]} : vector<8x128xf32> to vector<8x96xf32>
    %13 = arith.negf %12 : vector<8x96xf32>
    %14 = math.exp %13 : vector<8x96xf32>
    %cst_10 = arith.constant 1.000000e+00 : f32
    %15 = vector.broadcast %cst_10 : f32 to vector<8x96xf32>
    %16 = arith.addf %15, %14 : vector<8x96xf32>
    %17 = arith.divf %15, %16 : vector<8x96xf32>
    %18 = vector.extract_strided_slice %11 {offsets = [0, 96], sizes = [8, 32], strides = [1, 1]} : vector<8x128xf32> to vector<8x32xf32>
    %19 = math.tanh %18 : vector<8x32xf32>
    %20 = vector.extract_strided_slice %17 {offsets = [0, 0], sizes = [8, 32], strides = [1, 1]} : vector<8x96xf32> to vector<8x32xf32>
    %21 = vector.extract_strided_slice %17 {offsets = [0, 32], sizes = [8, 32], strides = [1, 1]} : vector<8x96xf32> to vector<8x32xf32>
    %22 = vector.extract_strided_slice %17 {offsets = [0, 64], sizes = [8, 32], strides = [1, 1]} : vector<8x96xf32> to vector<8x32xf32>
    %23 = arith.mulf %21, %8 : vector<8x32xf32>
    %24 = arith.mulf %20, %19 : vector<8x32xf32>
    %25 = arith.addf %23, %24 : vector<8x32xf32>
    %26 = math.tanh %25 : vector<8x32xf32>
    %27 = arith.mulf %22, %26 : vector<8x32xf32>
    %28 = vector.extract_strided_slice %27 {offsets = [0, 0], sizes = [8, 16], strides = [1, 1]} : vector<8x32xf32> to vector<8x16xf32>
    %c0_11 = arith.constant 0 : index
    %c0_12 = arith.constant 0 : index
    %29 = vector.load %arg8[%c0_11, %c0_12] : memref<64x32xf32, #tpu.memory_space<vmem>>, vector<8x16xf32>
    tpu.vector_store %arg8[%c0_11, %c0_12], %28 {strides = array<i32>} : memref<64x32xf32, #tpu.memory_space<vmem>>, vector<8x16xf32>,
    %30 = vector.extract_strided_slice %27 {offsets = [0, 16], sizes = [8, 16], strides = [1, 1]} : vector<8x32xf32> to vector<8x16xf32>
    %c56 = arith.constant 56 : index
    %c16 = arith.constant 16 : index
    %31 = vector.load %arg8[%c56, %c16] : memref<64x32xf32, #tpu.memory_space<vmem>>, vector<8x16xf32>
    tpu.vector_store %arg8[%c56, %c16], %30 {strides = array<i32>} : memref<64x32xf32, #tpu.memory_space<vmem>>, vector<8x16xf32>,
    %32 = vector.extract_strided_slice %5 {offsets = [8, 0], sizes = [8, 128], strides = [1, 1]} : vector<64x128xf32> to vector<8x128xf32>
    %cst_13 = arith.constant dense<0.000000e+00> : vector<8x128xf32>
    %33 = tpu.matmul %27, %6, %cst_13 {dimension_numbers = #tpu.dot_dimension_numbers<[1], [0], [0], [1], [0, 0, 1, 1], [], []>} : vector<8x32xf32>, vector<32x128xf32>, vector<8x128xf32> -> vector<8x128xf32>
    %34 = arith.addf %32, %33 : vector<8x128xf32>
    %35 = vector.extract_strided_slice %34 {offsets = [0, 0], sizes = [8, 96], strides = [1, 1]} : vector<8x128xf32> to vector<8x96xf32>
    %36 = arith.negf %35 : vector<8x96xf32>
    %37 = math.exp %36 : vector<8x96xf32>
    %cst_14 = arith.constant 1.000000e+00 : f32
    %38 = vector.broadcast %cst_14 : f32 to vector<8x96xf32>
    %39 = arith.addf %38, %37 : vector<8x96xf32>
    %40 = arith.divf %38, %39 : vector<8x96xf32>
    %41 = vector.extract_strided_slice %34 {offsets = [0, 96], sizes = [8, 32], strides = [1, 1]} : vector<8x128xf32> to vector<8x32xf32>
    %42 = math.tanh %41 : vector<8x32xf32>
    %43 = vector.extract_strided_slice %40 {offsets = [0, 0], sizes = [8, 32], strides = [1, 1]} : vector<8x96xf32> to vector<8x32xf32>
    %44 = vector.extract_strided_slice %40 {offsets = [0, 32], sizes = [8, 32], strides = [1, 1]} : vector<8x96xf32> to vector<8x32xf32>
    %45 = vector.extract_strided_slice %40 {offsets = [0, 64], sizes = [8, 32], strides = [1, 1]} : vector<8x96xf32> to vector<8x32xf32>
    %46 = arith.mulf %44, %25 : vector<8x32xf32>
    %47 = arith.mulf %43, %42 : vector<8x32xf32>
    %48 = arith.addf %46, %47 : vector<8x32xf32>
    %49 = math.tanh %48 : vector<8x32xf32>
    %50 = arith.mulf %45, %49 : vector<8x32xf32>
    %51 = vector.extract_strided_slice %50 {offsets = [0, 0], sizes = [8, 16], strides = [1, 1]} : vector<8x32xf32> to vector<8x16xf32>
    %c8 = arith.constant 8 : index
    %c0_15 = arith.constant 0 : index
    %52 = vector.load %arg8[%c8, %c0_15] : memref<64x32xf32, #tpu.memory_space<vmem>>, vector<8x16xf32>
    tpu.vector_store %arg8[%c8, %c0_15], %51 {strides = array<i32>} : memref<64x32xf32, #tpu.memory_space<vmem>>, vector<8x16xf32>,
    %53 = vector.extract_strided_slice %50 {offsets = [0, 16], sizes = [8, 16], strides = [1, 1]} : vector<8x32xf32> to vector<8x16xf32>
    %c48 = arith.constant 48 : index
    %c16_16 = arith.constant 16 : index
    %54 = vector.load %arg8[%c48, %c16_16] : memref<64x32xf32, #tpu.memory_space<vmem>>, vector<8x16xf32>
    tpu.vector_store %arg8[%c48, %c16_16], %53 {strides = array<i32>} : memref<64x32xf32, #tpu.memory_space<vmem>>, vector<8x16xf32>,
    %55 = vector.extract_strided_slice %5 {offsets = [16, 0], sizes = [8, 128], strides = [1, 1]} : vector<64x128xf32> to vector<8x128xf32>
    %cst_17 = arith.constant dense<0.000000e+00> : vector<8x128xf32>
    %56 = tpu.matmul %50, %6, %cst_17 {dimension_numbers = #tpu.dot_dimension_numbers<[1], [0], [0], [1], [0, 0, 1, 1], [], []>} : vector<8x32xf32>, vector<32x128xf32>, vector<8x128xf32> -> vector<8x128xf32>
    %57 = arith.addf %55, %56 : vector<8x128xf32>
    %58 = vector.extract_strided_slice %57 {offsets = [0, 0], sizes = [8, 96], strides = [1, 1]} : vector<8x128xf32> to vector<8x96xf32>
    %59 = arith.negf %58 : vector<8x96xf32>
    %60 = math.exp %59 : vector<8x96xf32>
    %cst_18 = arith.constant 1.000000e+00 : f32
    %61 = vector.broadcast %cst_18 : f32 to vector<8x96xf32>
    %62 = arith.addf %61, %60 : vector<8x96xf32>
    %63 = arith.divf %61, %62 : vector<8x96xf32>
    %64 = vector.extract_strided_slice %57 {offsets = [0, 96], sizes = [8, 32], strides = [1, 1]} : vector<8x128xf32> to vector<8x32xf32>
    %65 = math.tanh %64 : vector<8x32xf32>
    %66 = vector.extract_strided_slice %63 {offsets = [0, 0], sizes = [8, 32], strides = [1, 1]} : vector<8x96xf32> to vector<8x32xf32>
    %67 = vector.extract_strided_slice %63 {offsets = [0, 32], sizes = [8, 32], strides = [1, 1]} : vector<8x96xf32> to vector<8x32xf32>
    %68 = vector.extract_strided_slice %63 {offsets = [0, 64], sizes = [8, 32], strides = [1, 1]} : vector<8x96xf32> to vector<8x32xf32>
    %69 = arith.mulf %67, %48 : vector<8x32xf32>
    %70 = arith.mulf %66, %65 : vector<8x32xf32>
    %71 = arith.addf %69, %70 : vector<8x32xf32>
    %72 = math.tanh %71 : vector<8x32xf32>
    %73 = arith.mulf %68, %72 : vector<8x32xf32>
    %74 = vector.extract_strided_slice %73 {offsets = [0, 0], sizes = [8, 16], strides = [1, 1]} : vector<8x32xf32> to vector<8x16xf32>
    %c16_19 = arith.constant 16 : index
    %c0_20 = arith.constant 0 : index
    %75 = vector.load %arg8[%c16_19, %c0_20] : memref<64x32xf32, #tpu.memory_space<vmem>>, vector<8x16xf32>
    tpu.vector_store %arg8[%c16_19, %c0_20], %74 {strides = array<i32>} : memref<64x32xf32, #tpu.memory_space<vmem>>, vector<8x16xf32>,
    %76 = vector.extract_strided_slice %73 {offsets = [0, 16], sizes = [8, 16], strides = [1, 1]} : vector<8x32xf32> to vector<8x16xf32>
    %c40 = arith.constant 40 : index
    %c16_21 = arith.constant 16 : index
    %77 = vector.load %arg8[%c40, %c16_21] : memref<64x32xf32, #tpu.memory_space<vmem>>, vector<8x16xf32>
    tpu.vector_store %arg8[%c40, %c16_21], %76 {strides = array<i32>} : memref<64x32xf32, #tpu.memory_space<vmem>>, vector<8x16xf32>,
    %78 = vector.extract_strided_slice %5 {offsets = [24, 0], sizes = [8, 128], strides = [1, 1]} : vector<64x128xf32> to vector<8x128xf32>
    %cst_22 = arith.constant dense<0.000000e+00> : vector<8x128xf32>
    %79 = tpu.matmul %73, %6, %cst_22 {dimension_numbers = #tpu.dot_dimension_numbers<[1], [0], [0], [1], [0, 0, 1, 1], [], []>} : vector<8x32xf32>, vector<32x128xf32>, vector<8x128xf32> -> vector<8x128xf32>
    %80 = arith.addf %78, %79 : vector<8x128xf32>
    %81 = vector.extract_strided_slice %80 {offsets = [0, 0], sizes = [8, 96], strides = [1, 1]} : vector<8x128xf32> to vector<8x96xf32>
    %82 = arith.negf %81 : vector<8x96xf32>
    %83 = math.exp %82 : vector<8x96xf32>
    %cst_23 = arith.constant 1.000000e+00 : f32
    %84 = vector.broadcast %cst_23 : f32 to vector<8x96xf32>
    %85 = arith.addf %84, %83 : vector<8x96xf32>
    %86 = arith.divf %84, %85 : vector<8x96xf32>
    %87 = vector.extract_strided_slice %80 {offsets = [0, 96], sizes = [8, 32], strides = [1, 1]} : vector<8x128xf32> to vector<8x32xf32>
    %88 = math.tanh %87 : vector<8x32xf32>
    %89 = vector.extract_strided_slice %86 {offsets = [0, 0], sizes = [8, 32], strides = [1, 1]} : vector<8x96xf32> to vector<8x32xf32>
    %90 = vector.extract_strided_slice %86 {offsets = [0, 32], sizes = [8, 32], strides = [1, 1]} : vector<8x96xf32> to vector<8x32xf32>
    %91 = vector.extract_strided_slice %86 {offsets = [0, 64], sizes = [8, 32], strides = [1, 1]} : vector<8x96xf32> to vector<8x32xf32>
    %92 = arith.mulf %90, %71 : vector<8x32xf32>
    %93 = arith.mulf %89, %88 : vector<8x32xf32>
    %94 = arith.addf %92, %93 : vector<8x32xf32>
    %95 = math.tanh %94 : vector<8x32xf32>
    %96 = arith.mulf %91, %95 : vector<8x32xf32>
    %97 = vector.extract_strided_slice %96 {offsets = [0, 0], sizes = [8, 16], strides = [1, 1]} : vector<8x32xf32> to vector<8x16xf32>
    %c24 = arith.constant 24 : index
    %c0_24 = arith.constant 0 : index
    %98 = vector.load %arg8[%c24, %c0_24] : memref<64x32xf32, #tpu.memory_space<vmem>>, vector<8x16xf32>
    tpu.vector_store %arg8[%c24, %c0_24], %97 {strides = array<i32>} : memref<64x32xf32, #tpu.memory_space<vmem>>, vector<8x16xf32>,
    %99 = vector.extract_strided_slice %96 {offsets = [0, 16], sizes = [8, 16], strides = [1, 1]} : vector<8x32xf32> to vector<8x16xf32>
    %c32 = arith.constant 32 : index
    %c16_25 = arith.constant 16 : index
    %100 = vector.load %arg8[%c32, %c16_25] : memref<64x32xf32, #tpu.memory_space<vmem>>, vector<8x16xf32>
    tpu.vector_store %arg8[%c32, %c16_25], %99 {strides = array<i32>} : memref<64x32xf32, #tpu.memory_space<vmem>>, vector<8x16xf32>,
    %101 = vector.extract_strided_slice %5 {offsets = [32, 0], sizes = [8, 128], strides = [1, 1]} : vector<64x128xf32> to vector<8x128xf32>
    %cst_26 = arith.constant dense<0.000000e+00> : vector<8x128xf32>
    %102 = tpu.matmul %96, %6, %cst_26 {dimension_numbers = #tpu.dot_dimension_numbers<[1], [0], [0], [1], [0, 0, 1, 1], [], []>} : vector<8x32xf32>, vector<32x128xf32>, vector<8x128xf32> -> vector<8x128xf32>
    %103 = arith.addf %101, %102 : vector<8x128xf32>
    %104 = vector.extract_strided_slice %103 {offsets = [0, 0], sizes = [8, 96], strides = [1, 1]} : vector<8x128xf32> to vector<8x96xf32>
    %105 = arith.negf %104 : vector<8x96xf32>
    %106 = math.exp %105 : vector<8x96xf32>
    %cst_27 = arith.constant 1.000000e+00 : f32
    %107 = vector.broadcast %cst_27 : f32 to vector<8x96xf32>
    %108 = arith.addf %107, %106 : vector<8x96xf32>
    %109 = arith.divf %107, %108 : vector<8x96xf32>
    %110 = vector.extract_strided_slice %103 {offsets = [0, 96], sizes = [8, 32], strides = [1, 1]} : vector<8x128xf32> to vector<8x32xf32>
    %111 = math.tanh %110 : vector<8x32xf32>
    %112 = vector.extract_strided_slice %109 {offsets = [0, 0], sizes = [8, 32], strides = [1, 1]} : vector<8x96xf32> to vector<8x32xf32>
    %113 = vector.extract_strided_slice %109 {offsets = [0, 32], sizes = [8, 32], strides = [1, 1]} : vector<8x96xf32> to vector<8x32xf32>
    %114 = vector.extract_strided_slice %109 {offsets = [0, 64], sizes = [8, 32], strides = [1, 1]} : vector<8x96xf32> to vector<8x32xf32>
    %115 = arith.mulf %113, %94 : vector<8x32xf32>
    %116 = arith.mulf %112, %111 : vector<8x32xf32>
    %117 = arith.addf %115, %116 : vector<8x32xf32>
    %118 = math.tanh %117 : vector<8x32xf32>
    %119 = arith.mulf %114, %118 : vector<8x32xf32>
    %120 = vector.extract_strided_slice %119 {offsets = [0, 0], sizes = [8, 16], strides = [1, 1]} : vector<8x32xf32> to vector<8x16xf32>
    %c32_28 = arith.constant 32 : index
    %c0_29 = arith.constant 0 : index
    %121 = vector.load %arg8[%c32_28, %c0_29] : memref<64x32xf32, #tpu.memory_space<vmem>>, vector<8x16xf32>
    tpu.vector_store %arg8[%c32_28, %c0_29], %120 {strides = array<i32>} : memref<64x32xf32, #tpu.memory_space<vmem>>, vector<8x16xf32>,
    %122 = vector.extract_strided_slice %119 {offsets = [0, 16], sizes = [8, 16], strides = [1, 1]} : vector<8x32xf32> to vector<8x16xf32>
    %c24_30 = arith.constant 24 : index
    %c16_31 = arith.constant 16 : index
    %123 = vector.load %arg8[%c24_30, %c16_31] : memref<64x32xf32, #tpu.memory_space<vmem>>, vector<8x16xf32>
    tpu.vector_store %arg8[%c24_30, %c16_31], %122 {strides = array<i32>} : memref<64x32xf32, #tpu.memory_space<vmem>>, vector<8x16xf32>,
    %124 = vector.extract_strided_slice %5 {offsets = [40, 0], sizes = [8, 128], strides = [1, 1]} : vector<64x128xf32> to vector<8x128xf32>
    %cst_32 = arith.constant dense<0.000000e+00> : vector<8x128xf32>
    %125 = tpu.matmul %119, %6, %cst_32 {dimension_numbers = #tpu.dot_dimension_numbers<[1], [0], [0], [1], [0, 0, 1, 1], [], []>} : vector<8x32xf32>, vector<32x128xf32>, vector<8x128xf32> -> vector<8x128xf32>
    %126 = arith.addf %124, %125 : vector<8x128xf32>
    %127 = vector.extract_strided_slice %126 {offsets = [0, 0], sizes = [8, 96], strides = [1, 1]} : vector<8x128xf32> to vector<8x96xf32>
    %128 = arith.negf %127 : vector<8x96xf32>
    %129 = math.exp %128 : vector<8x96xf32>
    %cst_33 = arith.constant 1.000000e+00 : f32
    %130 = vector.broadcast %cst_33 : f32 to vector<8x96xf32>
    %131 = arith.addf %130, %129 : vector<8x96xf32>
    %132 = arith.divf %130, %131 : vector<8x96xf32>
    %133 = vector.extract_strided_slice %126 {offsets = [0, 96], sizes = [8, 32], strides = [1, 1]} : vector<8x128xf32> to vector<8x32xf32>
    %134 = math.tanh %133 : vector<8x32xf32>
    %135 = vector.extract_strided_slice %132 {offsets = [0, 0], sizes = [8, 32], strides = [1, 1]} : vector<8x96xf32> to vector<8x32xf32>
    %136 = vector.extract_strided_slice %132 {offsets = [0, 32], sizes = [8, 32], strides = [1, 1]} : vector<8x96xf32> to vector<8x32xf32>
    %137 = vector.extract_strided_slice %132 {offsets = [0, 64], sizes = [8, 32], strides = [1, 1]} : vector<8x96xf32> to vector<8x32xf32>
    %138 = arith.mulf %136, %117 : vector<8x32xf32>
    %139 = arith.mulf %135, %134 : vector<8x32xf32>
    %140 = arith.addf %138, %139 : vector<8x32xf32>
    %141 = math.tanh %140 : vector<8x32xf32>
    %142 = arith.mulf %137, %141 : vector<8x32xf32>
    %143 = vector.extract_strided_slice %142 {offsets = [0, 0], sizes = [8, 16], strides = [1, 1]} : vector<8x32xf32> to vector<8x16xf32>
    %c40_34 = arith.constant 40 : index
    %c0_35 = arith.constant 0 : index
    %144 = vector.load %arg8[%c40_34, %c0_35] : memref<64x32xf32, #tpu.memory_space<vmem>>, vector<8x16xf32>
    tpu.vector_store %arg8[%c40_34, %c0_35], %143 {strides = array<i32>} : memref<64x32xf32, #tpu.memory_space<vmem>>, vector<8x16xf32>,
    %145 = vector.extract_strided_slice %142 {offsets = [0, 16], sizes = [8, 16], strides = [1, 1]} : vector<8x32xf32> to vector<8x16xf32>
    %c16_36 = arith.constant 16 : index
    %c16_37 = arith.constant 16 : index
    %146 = vector.load %arg8[%c16_36, %c16_37] : memref<64x32xf32, #tpu.memory_space<vmem>>, vector<8x16xf32>
    tpu.vector_store %arg8[%c16_36, %c16_37], %145 {strides = array<i32>} : memref<64x32xf32, #tpu.memory_space<vmem>>, vector<8x16xf32>,
    %147 = vector.extract_strided_slice %5 {offsets = [48, 0], sizes = [8, 128], strides = [1, 1]} : vector<64x128xf32> to vector<8x128xf32>
    %cst_38 = arith.constant dense<0.000000e+00> : vector<8x128xf32>
    %148 = tpu.matmul %142, %6, %cst_38 {dimension_numbers = #tpu.dot_dimension_numbers<[1], [0], [0], [1], [0, 0, 1, 1], [], []>} : vector<8x32xf32>, vector<32x128xf32>, vector<8x128xf32> -> vector<8x128xf32>
    %149 = arith.addf %147, %148 : vector<8x128xf32>
    %150 = vector.extract_strided_slice %149 {offsets = [0, 0], sizes = [8, 96], strides = [1, 1]} : vector<8x128xf32> to vector<8x96xf32>
    %151 = arith.negf %150 : vector<8x96xf32>
    %152 = math.exp %151 : vector<8x96xf32>
    %cst_39 = arith.constant 1.000000e+00 : f32
    %153 = vector.broadcast %cst_39 : f32 to vector<8x96xf32>
    %154 = arith.addf %153, %152 : vector<8x96xf32>
    %155 = arith.divf %153, %154 : vector<8x96xf32>
    %156 = vector.extract_strided_slice %149 {offsets = [0, 96], sizes = [8, 32], strides = [1, 1]} : vector<8x128xf32> to vector<8x32xf32>
    %157 = math.tanh %156 : vector<8x32xf32>
    %158 = vector.extract_strided_slice %155 {offsets = [0, 0], sizes = [8, 32], strides = [1, 1]} : vector<8x96xf32> to vector<8x32xf32>
    %159 = vector.extract_strided_slice %155 {offsets = [0, 32], sizes = [8, 32], strides = [1, 1]} : vector<8x96xf32> to vector<8x32xf32>
    %160 = vector.extract_strided_slice %155 {offsets = [0, 64], sizes = [8, 32], strides = [1, 1]} : vector<8x96xf32> to vector<8x32xf32>
    %161 = arith.mulf %159, %140 : vector<8x32xf32>
    %162 = arith.mulf %158, %157 : vector<8x32xf32>
    %163 = arith.addf %161, %162 : vector<8x32xf32>
    %164 = math.tanh %163 : vector<8x32xf32>
    %165 = arith.mulf %160, %164 : vector<8x32xf32>
    %166 = vector.extract_strided_slice %165 {offsets = [0, 0], sizes = [8, 16], strides = [1, 1]} : vector<8x32xf32> to vector<8x16xf32>
    %c48_40 = arith.constant 48 : index
    %c0_41 = arith.constant 0 : index
    %167 = vector.load %arg8[%c48_40, %c0_41] : memref<64x32xf32, #tpu.memory_space<vmem>>, vector<8x16xf32>
    tpu.vector_store %arg8[%c48_40, %c0_41], %166 {strides = array<i32>} : memref<64x32xf32, #tpu.memory_space<vmem>>, vector<8x16xf32>,
    %168 = vector.extract_strided_slice %165 {offsets = [0, 16], sizes = [8, 16], strides = [1, 1]} : vector<8x32xf32> to vector<8x16xf32>
    %c8_42 = arith.constant 8 : index
    %c16_43 = arith.constant 16 : index
    %169 = vector.load %arg8[%c8_42, %c16_43] : memref<64x32xf32, #tpu.memory_space<vmem>>, vector<8x16xf32>
    tpu.vector_store %arg8[%c8_42, %c16_43], %168 {strides = array<i32>} : memref<64x32xf32, #tpu.memory_space<vmem>>, vector<8x16xf32>,
    %170 = vector.extract_strided_slice %5 {offsets = [56, 0], sizes = [8, 128], strides = [1, 1]} : vector<64x128xf32> to vector<8x128xf32>
    %cst_44 = arith.constant dense<0.000000e+00> : vector<8x128xf32>
    %171 = tpu.matmul %165, %6, %cst_44 {dimension_numbers = #tpu.dot_dimension_numbers<[1], [0], [0], [1], [0, 0, 1, 1], [], []>} : vector<8x32xf32>, vector<32x128xf32>, vector<8x128xf32> -> vector<8x128xf32>
    %172 = arith.addf %170, %171 : vector<8x128xf32>
    %173 = vector.extract_strided_slice %172 {offsets = [0, 0], sizes = [8, 96], strides = [1, 1]} : vector<8x128xf32> to vector<8x96xf32>
    %174 = arith.negf %173 : vector<8x96xf32>
    %175 = math.exp %174 : vector<8x96xf32>
    %cst_45 = arith.constant 1.000000e+00 : f32
    %176 = vector.broadcast %cst_45 : f32 to vector<8x96xf32>
    %177 = arith.addf %176, %175 : vector<8x96xf32>
    %178 = arith.divf %176, %177 : vector<8x96xf32>
    %179 = vector.extract_strided_slice %172 {offsets = [0, 96], sizes = [8, 32], strides = [1, 1]} : vector<8x128xf32> to vector<8x32xf32>
    %180 = math.tanh %179 : vector<8x32xf32>
    %181 = vector.extract_strided_slice %178 {offsets = [0, 0], sizes = [8, 32], strides = [1, 1]} : vector<8x96xf32> to vector<8x32xf32>
    %182 = vector.extract_strided_slice %178 {offsets = [0, 32], sizes = [8, 32], strides = [1, 1]} : vector<8x96xf32> to vector<8x32xf32>
    %183 = vector.extract_strided_slice %178 {offsets = [0, 64], sizes = [8, 32], strides = [1, 1]} : vector<8x96xf32> to vector<8x32xf32>
    %184 = arith.mulf %182, %163 : vector<8x32xf32>
    %185 = arith.mulf %181, %180 : vector<8x32xf32>
    %186 = arith.addf %184, %185 : vector<8x32xf32>
    %187 = math.tanh %186 : vector<8x32xf32>
    %188 = arith.mulf %183, %187 : vector<8x32xf32>
    %189 = vector.extract_strided_slice %188 {offsets = [0, 0], sizes = [8, 16], strides = [1, 1]} : vector<8x32xf32> to vector<8x16xf32>
    %c56_46 = arith.constant 56 : index
    %c0_47 = arith.constant 0 : index
    %190 = vector.load %arg8[%c56_46, %c0_47] : memref<64x32xf32, #tpu.memory_space<vmem>>, vector<8x16xf32>
    tpu.vector_store %arg8[%c56_46, %c0_47], %189 {strides = array<i32>} : memref<64x32xf32, #tpu.memory_space<vmem>>, vector<8x16xf32>,
    %191 = vector.extract_strided_slice %188 {offsets = [0, 16], sizes = [8, 16], strides = [1, 1]} : vector<8x32xf32> to vector<8x16xf32>
    %c0_48 = arith.constant 0 : index
    %c16_49 = arith.constant 16 : index
    %192 = vector.load %arg8[%c0_48, %c16_49] : memref<64x32xf32, #tpu.memory_space<vmem>>, vector<8x16xf32>
    tpu.vector_store %arg8[%c0_48, %c16_49], %191 {strides = array<i32>} : memref<64x32xf32, #tpu.memory_space<vmem>>, vector<8x16xf32>,
    %c0_50 = arith.constant 0 : index
    %c0_51 = arith.constant 0 : index
    %193 = vector.load %arg8[%c0_50, %c0_51] : memref<64x32xf32, #tpu.memory_space<vmem>>, vector<64x32xf32>
    %c0_52 = arith.constant 0 : index
    %c0_53 = arith.constant 0 : index
    %194 = vector.load %arg5[%c0_52, %c0_53] : memref<32x128xf32, #tpu.memory_space<vmem>>, vector<32x128xf32>
    %cst_54 = arith.constant dense<0.000000e+00> : vector<64x128xf32>
    %195 = tpu.matmul %193, %194, %cst_54 {dimension_numbers = #tpu.dot_dimension_numbers<[1], [0], [0], [1], [0, 0, 1, 1], [], []>} : vector<64x32xf32>, vector<32x128xf32>, vector<64x128xf32> -> vector<64x128xf32>
    %c0_55 = arith.constant 0 : index
    %c0_56 = arith.constant 0 : index
    %196 = vector.load %arg1[%c0_55, %c0_56] : memref<64x1xf32, #tpu.memory_space<vmem>>, vector<64x1xf32>
    %197 = vector.broadcast %196 : vector<64x1xf32> to vector<64x128xf32>
    %198 = arith.mulf %197, %195 : vector<64x128xf32>
    %c0_57 = arith.constant 0 : index
    %c0_58 = arith.constant 0 : index
    %199 = vector.load %arg6[%c0_57, %c0_58] : memref<1x128xf32, #tpu.memory_space<vmem>>, vector<1x128xf32>
    %200 = vector.broadcast %199 : vector<1x128xf32> to vector<64x128xf32>
    %201 = arith.addf %198, %200 : vector<64x128xf32>
    %c0_59 = arith.constant 0 : index
    %c0_60 = arith.constant 0 : index
    %202 = vector.load %arg7[%c0_59, %c0_60] : memref<64x128xf32, #tpu.memory_space<vmem>>, vector<64x128xf32>
    tpu.vector_store %arg7[%c0_59, %c0_60], %201 {strides = array<i32>} : memref<64x128xf32, #tpu.memory_space<vmem>>, vector<64x128xf32>,
    return
  }
}

</mosaic_0001>

<bundles_post_ra>
// kernel: tpu_custom_call.1
= control target key start
LH: loop header
LB: loop body
LE: loop exit
PB: predicated region body
PF: predicated region fallthrough
CT: control target
= control target key end

     0   :  { %12 = vsyncpa [#allocation4], 0  ;;  %s2087_s0 = inlined_call_operand.vmem [shape: f32[64,64], index: 0, kind: input, shape index: {}]   ;;  %s2088_s1 = inlined_call_operand.vmem [shape: f32[64,1], index: 1, kind: input, shape index: {}]   ;;  %s2089_s2 = inlined_call_operand.hbm [shape: f32[64,128], index: 2, kind: input, shape index: {}]   ;;  %s2090_s3 = inlined_call_operand.hbm [shape: f32[32,128], index: 3, kind: input, shape index: {}]   ;;  %s2091_s4 = inlined_call_operand.vmem [shape: f32[1,128], index: 4, kind: input, shape index: {}]   ;;  %s2092_s5 = inlined_call_operand.hbm [shape: f32[32,128], index: 5, kind: input, shape index: {}]   ;;  %s2093_s6 = inlined_call_operand.vmem [shape: f32[1,128], index: 6, kind: input, shape index: {}]   ;;  %s2094_s7 = inlined_call_operand.hbm [shape: f32[64,128], index: 7, kind: output, shape index: {}]  }
   0x1   :  { %13 = vsyncpa [#allocation7], 0 }
   0x2   :  { %14 = vsyncpa [#allocation5], 0  ;;  %s1772_s24 = smov [#allocation6]   ;;  %s1773_s26 = smov [#allocation3]  }
   0x3   :  { %s36_s25 = sshll.u32 %s1772_s24, 4  ;;  %s24_s27 = sshll.u32 %s1773_s26, 4  ;;  %s37_s25 = int_to_ptr.vmem [resolvable:$true] %s36_s25  ;;  %s1824_s27 = int_to_ptr.vmem [resolvable:$true] %s24_s27 }
   0x4   :  { %s1678_s30 = scalar_lea.hbm %s2090_s3, 512 }
   0x5   :  { %p1679_p0 = scmp.ne.s32.totalorder %s2090_s3, %s1678_s30  ;;  %p1682_p1 = scmp.lt.u32.totalorder %s1678_s30, %s2090_s3 }
   0x7   :  { %p1684_p2 = pnand %p1682_p1, %p1679_p0 }
   0x9   :  { %1687 = shalt.err (!%p1684_p2)
}
   0xa   :  { %s1688_s12 = scalar_lea.vmem %s37_s25, 512  ;;  %p1693_p4 = scmp.lt.s32.totalorder %s37_s25, %s37_s25 }
   0xb   :  { %p1689_p3 = scmp.ne.s32.totalorder %s37_s25, %s1688_s12  ;;  %p1694_p5 = scmp.lt.s32.totalorder %s1688_s12, %s1688_s12 }
   0xd   :  { %p1695_p6 = por %p1694_p5, %p1693_p4 }
   0xf   :  { %p1696_p7 = pnand %p1695_p6, %p1689_p3 }
  0x11   :  { %1699 = shalt.err (!%p1696_p7)
}
  0x12   :  { %s1774_s13 = smov 128   ;;  %s1775_s14 = smov 8  }
  0x13   :  { %42 = dma.hbm_to_vmem [thread:$0]  %s2090_s3, 512, %s37_s25, [#allocation7], %s1774_s13, %s1774_s13, %s1775_s14  }
  0x14   :  { %s1700_s19 = scalar_lea.hbm %s2089_s2, 1024 }
  0x15   :  { %p1701_p8 = scmp.ne.s32.totalorder %s2089_s2, %s1700_s19  ;;  %p1704_p9 = scmp.lt.u32.totalorder %s1700_s19, %s2089_s2 }
  0x17   :  { %p1706_p10 = pnand %p1704_p9, %p1701_p8 }
  0x19   :  { %1709 = shalt.err (!%p1706_p10)
}
  0x1a   :  { %s1710_s24 = scalar_lea.vmem %s1824_s27, 1024  ;;  %p1715_p12 = scmp.lt.s32.totalorder %s1824_s27, %s1824_s27 }
  0x1b   :  { %p1711_p11 = scmp.ne.s32.totalorder %s1824_s27, %s1710_s24  ;;  %p1716_p13 = scmp.lt.s32.totalorder %s1710_s24, %s1710_s24 }
  0x1d   :  { %p1717_p0 = por %p1716_p13, %p1715_p12 }
  0x1f   :  { %p1718_p1 = pnand %p1717_p0, %p1711_p11 }
  0x21   :  { %1721 = shalt.err (!%p1718_p1)
}
  0x22   :  { %30 = dma.hbm_to_vmem [thread:$0]  %s2089_s2, 1024, %s1824_s27, [#allocation4], %s1774_s13, %s1774_s13, %s1775_s14  }
  0x23   :  { %s1776_s26 = smov [#allocation8]   ;;  %s1722_s8 = scalar_lea.hbm %s2092_s5, 512 }
  0x24   :  { %s50_s28 = sshll.u32 %s1776_s26, 4  ;;  %p1723_p2 = scmp.ne.s32.totalorder %s2092_s5, %s1722_s8  ;;  %s51_s28 = int_to_ptr.vmem [resolvable:$true] %s50_s28 }
  0x25   :  { %p1726_p3 = scmp.lt.u32.totalorder %s1722_s8, %s2092_s5 }
  0x27   :  { %p1728_p4 = pnand %p1726_p3, %p1723_p2 }
  0x29   :  { %1731 = shalt.err (!%p1728_p4)
}
  0x2a   :  { %s1732_s15 = scalar_lea.vmem %s51_s28, 512  ;;  %p1737_p6 = scmp.lt.s32.totalorder %s51_s28, %s51_s28 }
  0x2b   :  { %p1733_p5 = scmp.ne.s32.totalorder %s51_s28, %s1732_s15  ;;  %p1738_p7 = scmp.lt.s32.totalorder %s1732_s15, %s1732_s15 }
  0x2d   :  { %p1739_p8 = por %p1738_p7, %p1737_p6 }
  0x2f   :  { %p1740_p9 = pnand %p1739_p8, %p1733_p5 }
  0x31   :  { %1743 = shalt.err (!%p1740_p9)
}
  0x32   :  { %56 = dma.hbm_to_vmem [thread:$0]  %s2092_s5, 512, %s51_s28, [#allocation7], %s1774_s13, %s1774_s13, %s1775_s14  }
  0x33   :  { %1766 = dma.done.wait [#allocation4], 1024  }
  0x34   :  { %1767 = vsyncadd [#allocation4], 4294966272 }
  0x35   :  { %1768 = dma.done.wait [#allocation7], 1024  }
  0x36   :  { %1769 = vsyncadd [#allocation7], 4294966272  ;;  %v1777_v0 = vmov 0.0|0.0   ;;  %vm1778_vm0 = vmmov 0   ;;  %v1779_v1 = vmov 0.0   ;;  %v76_v2 = vld [vmem:[#allocation3] sm:$0xff] }
  0x37   :  { %1550 = vmatprep.subr.bf16.mxu1 %v1777_v0  ;;  %1439 = vmatprep.mubr.msk.f32.mxu1 %vm1778_vm0, %v1779_v1  ;;  %v77_v3 = vld [vmem:[#allocation3 + $0x8] sm:$0xff]  ;;  %v78_v4 = vld [vmem:[#allocation3 + $0x10] sm:$0xff]  ;;  %vm91_vm1 = vcmask 523264   ;;  %v79_v6 = vld [vmem:[#allocation3 + $0x18] sm:$0xff]  ;;  %s1781_s9 = smov 64   ;;  %vm328_vm2 = vcmask 130048  }
  0x38   :  { %v1528_v5 = vpack.c.bf16 %v77_v3, %v76_v2  ;;  %v1532_v7 = vpack.c.bf16 %v79_v6, %v78_v4  ;;  %v80_v8 = vld [vmem:[#allocation3 + $0x20] sm:$0xff]  ;;  %v81_v9 = vld [vmem:[#allocation3 + $0x28] sm:$0xff]  ;;  %v223_v15 = vld [vmem:[#allocation6 + $0x10] sm:$0xff]  ;;  %vm330_vm3 = vcmask 261248   ;;  %vm225_vm4 = vcmask 261120  }
  0x39   :  { %v68_v10 = vld [vmem:[%s2087_s0] sm:$0xff]  ;;  %v222_v12 = vld [vmem:[#allocation6 + $0x8] sm:$0xff]  ;;  %v1536_v14 = vpack.c.bf16 %v81_v9, %v80_v8  ;;  %v224_v16 = vld [vmem:[#allocation6 + $0x18] sm:$0xff] }
  0x3a   :  { %1529 = vmatprep.subr.bf16.mxu0 %v1528_v5  ;;  %1408 = vmatprep.mubr.msk.f32.mxu0 %vm91_vm1, %v68_v10  ;;  %v221_v11 = vld [vmem:[#allocation6] sm:$0xff]  ;;  %v82_v17 = vld [vmem:[#allocation3 + $0x30] sm:$0xff]  ;;  %v83_v18 = vld [vmem:[#allocation3 + $0x38] sm:$0xff]  ;;  %v1887_v19 = vpack.c.bf16 %v224_v16, %v223_v15 }
  0x3b   :  { %1531 = vmatpush3.bf16.msra.mxu0 %v1528_v5  ;;  %v1883_v13 = vpack.c.bf16 %v222_v12, %v221_v11  ;;  %v1540_v20 = vpack.c.bf16 %v83_v18, %v82_v17  ;;  %v69_v21 = vld [vmem:[%s2087_s0 + $0x8] sm:$0xff]  ;;  %v70_v22 = vld [vmem:[%s2087_s0 + $0x10] sm:$0xff]  ;;  %v71_v23 = vld [vmem:[%s2087_s0 + $0x18] sm:$0xff] }
  0x3c   :  { %1533 = vmatprep.subr.bf16.mxu0 %v1532_v7  ;;  %v72_v24 = vld [vmem:[%s2087_s0 + $0x20] sm:$0xff]  ;;  %v73_v25 = vld [vmem:[%s2087_s0 + $0x28] sm:$0xff]  ;;  %v74_v26 = vld [vmem:[%s2087_s0 + $0x30] sm:$0xff] }
  0x3d   :  { %1552 = vmatpush3.bf16.msra.mxu1 %v1883_v13  ;;  %v75_v27 = vld [vmem:[%s2087_s0 + $0x38] sm:$0xff]  ;;  %v1291_v28 = vld [vmem:[%s2091_s4] ss:$0 sm:$0xff]  ;;  %s1780_s4 = smov 32  }
  0x3e   :  { %1553 = vmatprep.subr.bf16.mxu1 %v1777_v0 }
  0x3f   :  { %1535 = vmatpush3.bf16.msra.mxu0 %v1532_v7 }
  0x40   :  { %1537 = vmatprep.subr.bf16.mxu0 %v1536_v14 }
  0x41   :  { %1555 = vmatpush3.bf16.msra.mxu1 %v1887_v19 }
  0x42   :  { %1556 = vmatprep.subr.bf16.mxu1 %v1777_v0 }
  0x43   :  { %1539 = vmatpush3.bf16.msra.mxu0 %v1536_v14 }
  0x44   :  { %1541 = vmatprep.subr.bf16.mxu0 %v1540_v20 }
  0x47   :  { %1543 = vmatpush3.bf16.msra.mxu0 %v1540_v20 }
  0x48   :  { %1544 = vmatprep.subr.bf16.mxu0 %v1777_v0 }
  0x4a   :  { %1409 = vmatmul.mubr.msk.f32.vlgmr.msra.gmra.mrb[0].mxu0 %vm91_vm1, %v69_v21 }
  0x4b   :  { %1546 = vmatpush3.bf16.msra.mxu0 %v1883_v13  ;;  %1411 = vmatprep.mubr.msk.f32.mxu0 %vm91_vm1, %v70_v22 }
  0x4c   :  { %1547 = vmatprep.subr.bf16.mxu0 %v1777_v0 }
  0x4e   :  { %1412 = vmatmul.mubr.msk.f32.gmra.mrb[2].mxu0 %vm91_vm1, %v71_v23 }
  0x4f   :  { %1414 = vmatprep.mubr.msk.f32.mxu0 %vm91_vm1, %v72_v24  ;;  %1549 = vmatpush3.bf16.msra.mxu0 %v1887_v19 }
  0x50   :  { %1562 = vmatprep.subr.bf16.mxu0 %v1777_v0 }
  0x52   :  { %1415 = vmatmul.mubr.msk.f32.gmra.mrb[4].mxu0 %vm91_vm1, %v73_v25 }
  0x53   :  { %1417 = vmatprep.mubr.msk.f32.mxu0 %vm91_vm1, %v74_v26 }
  0x56   :  { %1418 = vmatmul.mubr.msk.f32.gmra.mrb[6].mxu0 %vm91_vm1, %v75_v27 }
  0x57   :  { %1428 = vmatprep.mubr.msk.f32.mxu0 %vm1778_vm0, %v1779_v1 }
  0x5a   :  { %1429 = vmatmul.mubr.f32.vlgmr.msra.gmra.mrb[8].mxu0 %v1779_v1 }
  0x5b   :  { %1564 = vmatpush3.bf16.msra.mxu0 %v1883_v13  ;;  %1461 = vmatprep.mubr.msk.f32.mxu0 %vm1778_vm0, %v1779_v1 }
  0x5c   :  { %1565 = vmatprep.subr.bf16.mxu0 %v1777_v0 }
  0x5f   :  { %1567 = vmatpush3.bf16.msra.mxu0 %v1887_v19 }
  0x60   :  { %1574 = vmatprep.subr.bf16.mxu0 %v1777_v0 }
 0x11d   :  { %v1410_v29 = vpop.f32.mrb[0].mxu0 }
 0x11e   :  { %v188_v30 = vadd.f32 %v1410_v29, %v1291_v28  ;;  %v182_v31 = vpop.f32.mrb[1].mxu0 }
 0x11f   :  { %v183_v44 = vadd.f32 %v1291_v28, %v182_v31 }
 0x121   :  { %v1413_v32 = vpop.f32.mrb[2].mxu0 }
 0x122   :  { %v1936_v33 = vadd.f32 %v1413_v32, %v1291_v28  ;;  %v192_v34 = vpop.f32.mrb[3].mxu0 }
 0x123   :  { %v1938_v35 = vadd.f32 %v1291_v28, %v192_v34 }
 0x125   :  { %v1416_v36 = vpop.f32.mrb[4].mxu0 }
 0x126   :  { %v1940_v37 = vadd.f32 %v1416_v36, %v1291_v28  ;;  %v202_v38 = vpop.f32.mrb[5].mxu0 }
 0x127   :  { %v1942_v39 = vadd.f32 %v1291_v28, %v202_v38 }
 0x129   :  { %v1419_v40 = vpop.f32.mrb[6].mxu0 }
 0x12a   :  { %v1944_v41 = vadd.f32 %v1419_v40, %v1291_v28  ;;  %v212_v42 = vpop.f32.mrb[7].mxu0 }
 0x12b   :  { %v1946_v43 = vadd.f32 %v1291_v28, %v212_v42 }
 0x12d   :  { %v295_v45 = vpop.f32.mrb[8].mxu0 }
 0x12e   :  { %v299_v46 = vadd.f32 %v295_v45, %v183_v44  ;;  %v1430_v47 = vpop.f32.mrb[9].mxu0 }
 0x130   :  { %1614 = vtanh.f32 %v299_v46  ;;  %v1300_v49 = vmul.f32 -1.442695, %v299_v46 }
 0x132   :  { %1616 = vpow2.f32 %v1300_v49 }
 0x13a   :  { %v1615_v48 = vpop.eup %1614 }
 0x13b   :  { %309 = vrot.lane.b32.xlu0 %v1615_v48, %s1780_s4 }
 0x13c   :  { %v1617_v50 = vpop.eup %1616 }
 0x13d   :  { %v303_v51 = vadd.f32 1.0, %v1617_v50 }
 0x13f   :  { %1618 = vrcp.f32 %v303_v51 }
 0x149   :  { %v1619_v52 = vpop.eup %1618 }
 0x14a   :  { %v307_v55 = vmul.f32 0.0, %v1619_v52 }
 0x1ad   :  { %v310_v53 = vpop.permute.xlu0 %309 }
 0x1ae   :  { %v312_v54 = vmul.f32 %v1619_v52, %v310_v53 }
 0x1b0   :  { %314 = vrot.lane.b32.xlu0 %v312_v54, %s1780_s4 }
 0x222   :  { %v315_v56 = vpop.permute.xlu0 %314 }
 0x223   :  { %v317_v57 = vadd.f32 %v315_v56, %v307_v55 }
 0x225   :  { %1620 = vtanh.f32 %v317_v57 }
 0x22f   :  { %v1621_v58 = vpop.eup %1620 }
 0x230   :  { %320 = vrot.lane.b32.xlu1 %v1621_v58, %s1780_s4 }
 0x2a2   :  { %v321_v59 = vpop.permute.xlu1 %320 }
 0x2a3   :  { %v323_v60 = vmul.f32 %v1619_v52, %v321_v59 }
 0x2a5   :  { %325 = vrot.lane.b32.xlu1 %v323_v60, %s1781_s9 }
 0x317   :  { %v326_v61 = vpop.permute.xlu1 %325 }
 0x318   :  { %329 = vst.msk [vmem:[#allocation2] sm:$0xff] %vm328_vm2, %v326_v61  ;;  %1440 = vmatmul.mubr.msk.f32.vlgmr.msra.gmra.mrb[0].mxu1 %vm225_vm4, %v326_v61 }
 0x319   :  { %331 = vst.msk [vmem:[#allocation2 + $0x38] sm:$0xff] %vm330_vm3, %v326_v61  ;;  %1558 = vmatpush3.bf16.msra.mxu1 %v1883_v13  ;;  %1450 = vmatprep.mubr.msk.f32.mxu1 %vm1778_vm0, %v1779_v1 }
 0x31a   :  { %1559 = vmatprep.subr.bf16.mxu1 %v1777_v0 }
 0x31d   :  { %1561 = vmatpush3.bf16.msra.mxu1 %v1887_v19 }
 0x31e   :  { %1568 = vmatprep.subr.bf16.mxu1 %v1777_v0 }
 0x3eb   :  { %v400_v62 = vpop.f32.mrb[0].mxu1 }
 0x3ec   :  { %v404_v63 = vadd.f32 %v400_v62, %v188_v30  ;;  %v1441_v2 = vpop.f32.mrb[1].mxu1 }
 0x3ee   :  { %1622 = vtanh.f32 %v404_v63  ;;  %v1302_v4 = vmul.f32 -1.442695, %v404_v63 }
 0x3f0   :  { %1624 = vpow2.f32 %v1302_v4 }
 0x3f8   :  { %v1623_v3 = vpop.eup %1622 }
 0x3f9   :  { %414 = vrot.lane.b32.xlu0 %v1623_v3, %s1780_s4 }
 0x3fa   :  { %v1625_v5 = vpop.eup %1624 }
 0x3fb   :  { %v408_v6 = vadd.f32 1.0, %v1625_v5 }
 0x3fd   :  { %1626 = vrcp.f32 %v408_v6 }
 0x407   :  { %v1627_v7 = vpop.eup %1626 }
 0x408   :  { %v412_v10 = vmul.f32 %v1627_v7, %v317_v57 }
 0x46b   :  { %v415_v8 = vpop.permute.xlu0 %414 }
 0x46c   :  { %v417_v9 = vmul.f32 %v1627_v7, %v415_v8 }
 0x46e   :  { %419 = vrot.lane.b32.xlu1 %v417_v9, %s1780_s4 }
 0x4e0   :  { %v420_v11 = vpop.permute.xlu1 %419 }
 0x4e1   :  { %v422_v12 = vadd.f32 %v420_v11, %v412_v10 }
 0x4e3   :  { %1628 = vtanh.f32 %v422_v12 }
 0x4ed   :  { %v1629_v14 = vpop.eup %1628 }
 0x4ee   :  { %425 = vrot.lane.b32.xlu0 %v1629_v14, %s1780_s4 }
 0x560   :  { %v426_v15 = vpop.permute.xlu0 %425 }
 0x561   :  { %v428_v16 = vmul.f32 %v1627_v7, %v426_v15 }
 0x563   :  { %430 = vrot.lane.b32.xlu1 %v428_v16, %s1781_s9 }
 0x5d5   :  { %v431_v17 = vpop.permute.xlu1 %430 }
 0x5d6   :  { %433 = vst.msk [vmem:[#allocation2 + $0x8] sm:$0xff] %vm328_vm2, %v431_v17  ;;  %1451 = vmatmul.mubr.msk.f32.vlgmr.msra.gmra.mrb[2].mxu1 %vm225_vm4, %v431_v17 }
 0x5d7   :  { %434 = vst.msk [vmem:[#allocation2 + $0x30] sm:$0xff] %vm330_vm3, %v431_v17  ;;  %1570 = vmatpush3.bf16.msra.mxu1 %v1883_v13  ;;  %1472 = vmatprep.mubr.msk.f32.mxu1 %vm1778_vm0, %v1779_v1 }
 0x5d8   :  { %1571 = vmatprep.subr.bf16.mxu1 %v1777_v0 }
 0x5db   :  { %1573 = vmatpush3.bf16.msra.mxu1 %v1887_v19 }
 0x5dc   :  { %1580 = vmatprep.subr.bf16.mxu1 %v1777_v0 }
 0x6a9   :  { %v503_v18 = vpop.f32.mrb[2].mxu1 }
 0x6aa   :  { %v507_v20 = vadd.f32 %v503_v18, %v1938_v35  ;;  %v1452_v21 = vpop.f32.mrb[3].mxu1 }
 0x6ac   :  { %1630 = vtanh.f32 %v507_v20  ;;  %v1304_v23 = vmul.f32 -1.442695, %v507_v20 }
 0x6ae   :  { %1632 = vpow2.f32 %v1304_v23 }
 0x6b6   :  { %v1631_v22 = vpop.eup %1630 }
 0x6b7   :  { %517 = vrot.lane.b32.xlu0 %v1631_v22, %s1780_s4 }
 0x6b8   :  { %v1633_v24 = vpop.eup %1632 }
 0x6b9   :  { %v511_v25 = vadd.f32 1.0, %v1633_v24 }
 0x6bb   :  { %1634 = vrcp.f32 %v511_v25 }
 0x6c5   :  { %v1635_v26 = vpop.eup %1634 }
 0x6c6   :  { %v515_v29 = vmul.f32 %v1635_v26, %v422_v12 }
 0x729   :  { %v518_v27 = vpop.permute.xlu0 %517 }
 0x72a   :  { %v520_v28 = vmul.f32 %v1635_v26, %v518_v27 }
 0x72c   :  { %522 = vrot.lane.b32.xlu1 %v520_v28, %s1780_s4 }
 0x79e   :  { %v523_v30 = vpop.permute.xlu1 %522 }
 0x79f   :  { %v525_v31 = vadd.f32 %v523_v30, %v515_v29 }
 0x7a1   :  { %1636 = vtanh.f32 %v525_v31 }
 0x7ab   :  { %v1637_v32 = vpop.eup %1636 }
 0x7ac   :  { %528 = vrot.lane.b32.xlu0 %v1637_v32, %s1780_s4 }
 0x81e   :  { %v529_v34 = vpop.permute.xlu0 %528 }
 0x81f   :  { %v531_v35 = vmul.f32 %v1635_v26, %v529_v34 }
 0x821   :  { %533 = vrot.lane.b32.xlu1 %v531_v35, %s1781_s9 }
 0x893   :  { %v534_v36 = vpop.permute.xlu1 %533 }
 0x894   :  { %536 = vst.msk [vmem:[#allocation2 + $0x10] sm:$0xff] %vm328_vm2, %v534_v36  ;;  %1462 = vmatmul.mubr.msk.f32.vlgmr.msra.gmra.mrb[10].mxu0 %vm225_vm4, %v534_v36 }
 0x895   :  { %537 = vst.msk [vmem:[#allocation2 + $0x28] sm:$0xff] %vm330_vm3, %v534_v36  ;;  %1576 = vmatpush3.bf16.msra.mxu0 %v1883_v13  ;;  %1483 = vmatprep.mubr.msk.f32.mxu0 %vm1778_vm0, %v1779_v1 }
 0x896   :  { %1577 = vmatprep.subr.bf16.mxu0 %v1777_v0 }
 0x899   :  { %1579 = vmatpush3.bf16.msra.mxu0 %v1887_v19 }
 0x89a   :  { %1586 = vmatprep.subr.bf16.mxu0 %v1777_v0 }
 0x967   :  { %v606_v38 = vpop.f32.mrb[10].mxu0 }
 0x968   :  { %v610_v40 = vadd.f32 %v606_v38, %v1936_v33  ;;  %v1463_v42 = vpop.f32.mrb[11].mxu0 }
 0x96a   :  { %1638 = vtanh.f32 %v610_v40  ;;  %v1306_v45 = vmul.f32 -1.442695, %v610_v40 }
 0x96c   :  { %1640 = vpow2.f32 %v1306_v45 }
 0x974   :  { %v1639_v44 = vpop.eup %1638 }
 0x975   :  { %620 = vrot.lane.b32.xlu0 %v1639_v44, %s1780_s4 }
 0x976   :  { %v1641_v46 = vpop.eup %1640 }
 0x977   :  { %v614_v47 = vadd.f32 1.0, %v1641_v46 }
 0x979   :  { %1642 = vrcp.f32 %v614_v47 }
 0x983   :  { %v1643_v48 = vpop.eup %1642 }
 0x984   :  { %v618_v51 = vmul.f32 %v1643_v48, %v525_v31 }
 0x9e7   :  { %v621_v49 = vpop.permute.xlu0 %620 }
 0x9e8   :  { %v623_v50 = vmul.f32 %v1643_v48, %v621_v49 }
 0x9ea   :  { %625 = vrot.lane.b32.xlu1 %v623_v50, %s1780_s4 }
 0xa5c   :  { %v626_v52 = vpop.permute.xlu1 %625 }
 0xa5d   :  { %v628_v53 = vadd.f32 %v626_v52, %v618_v51 }
 0xa5f   :  { %1644 = vtanh.f32 %v628_v53 }
 0xa69   :  { %v1645_v33 = vpop.eup %1644 }
 0xa6a   :  { %631 = vrot.lane.b32.xlu0 %v1645_v33, %s1780_s4 }
 0xadc   :  { %v632_v54 = vpop.permute.xlu0 %631 }
 0xadd   :  { %v634_v55 = vmul.f32 %v1643_v48, %v632_v54 }
 0xadf   :  { %636 = vrot.lane.b32.xlu1 %v634_v55, %s1781_s9 }
 0xb51   :  { %v637_v56 = vpop.permute.xlu1 %636 }
 0xb52   :  { %639 = vst.msk [vmem:[#allocation2 + $0x18] sm:$0xff] %vm328_vm2, %v637_v56  ;;  %1473 = vmatmul.mubr.msk.f32.vlgmr.msra.gmra.mrb[4].mxu1 %vm225_vm4, %v637_v56 }
 0xb53   :  { %640 = vst.msk [vmem:[#allocation2 + $0x20] sm:$0xff] %vm330_vm3, %v637_v56  ;;  %1582 = vmatpush3.bf16.msra.mxu1 %v1883_v13  ;;  %1494 = vmatprep.mubr.msk.f32.mxu1 %vm1778_vm0, %v1779_v1 }
 0xb54   :  { %1583 = vmatprep.subr.bf16.mxu1 %v1777_v0 }
 0xb57   :  { %1585 = vmatpush3.bf16.msra.mxu1 %v1887_v19 }
 0xc25   :  { %v709_v57 = vpop.f32.mrb[4].mxu1 }
 0xc26   :  { %v713_v58 = vadd.f32 %v709_v57, %v1942_v39  ;;  %v1474_v59 = vpop.f32.mrb[5].mxu1 }
 0xc27   :  { %v1062_v59 = vld [vmem:[#allocation8 + $0x8] sm:$0xff] }
 0xc28   :  { %1646 = vtanh.f32 %v713_v58  ;;  %v1308_v61 = vmul.f32 -1.442695, %v713_v58  ;;  %v1061_v58 = vld [vmem:[#allocation8] sm:$0xff] }
 0xc2a   :  { %1648 = vpow2.f32 %v1308_v61  ;;  %v1063_v61 = vld [vmem:[#allocation8 + $0x10] sm:$0xff] }
 0xc32   :  { %v1647_v60 = vpop.eup %1646 }
 0xc33   :  { %723 = vrot.lane.b32.xlu0 %v1647_v60, %s1780_s4  ;;  %v1592_v60 = vpack.c.bf16 %v1062_v59, %v1061_v58 }
 0xc34   :  { %v1649_v62 = vpop.eup %1648 }
 0xc35   :  { %v717_v63 = vadd.f32 1.0, %v1649_v62  ;;  %v1064_v62 = vld [vmem:[#allocation8 + $0x18] sm:$0xff]  ;;  %1593 = vmatprep.subr.bf16.mxu1 %v1592_v60 }
 0xc37   :  { %1650 = vrcp.f32 %v717_v63  ;;  %v1596_v63 = vpack.c.bf16 %v1064_v62, %v1063_v61 }
 0xc41   :  { %v1651_v2 = vpop.eup %1650 }
 0xc42   :  { %v721_v5 = vmul.f32 %v1651_v2, %v628_v53 }
 0xca5   :  { %v724_v3 = vpop.permute.xlu0 %723 }
 0xca6   :  { %v726_v4 = vmul.f32 %v1651_v2, %v724_v3 }
 0xca8   :  { %728 = vrot.lane.b32.xlu1 %v726_v4, %s1780_s4  ;;  %v1194_v4 = vld [vmem:[%s2088_s1] sm:$0xff] }
 0xd1a   :  { %v729_v6 = vpop.permute.xlu1 %728 }
 0xd1b   :  { %v731_v7 = vadd.f32 %v729_v6, %v721_v5  ;;  %v1195_v5 = vld [vmem:[%s2088_s1 + $0x8] sm:$0xff]  ;;  %v1782_v6 = vmov 0  }
 0xd1c   :  { %1613 = vset.pattern.permute.xlu1 %v1782_v6  ;;  %1612 = vset.pattern.permute.xlu0 %v1782_v6 }
 0xd1d   :  { %1652 = vtanh.f32 %v731_v7 }
 0xd27   :  { %v1653_v39 = vpop.eup %1652 }
 0xd28   :  { %734 = vrot.lane.b32.xlu0 %v1653_v39, %s1780_s4  ;;  %v1196_v39 = vld [vmem:[%s2088_s1 + $0x10] sm:$0xff] }
 0xd9a   :  { %v735_v8 = vpop.permute.xlu0 %734 }
 0xd9b   :  { %v737_v9 = vmul.f32 %v1651_v2, %v735_v8  ;;  %v1199_v8 = vld [vmem:[%s2088_s1 + $0x28] sm:$0xff] }
 0xd9d   :  { %739 = vrot.lane.b32.xlu1 %v737_v9, %s1781_s9  ;;  %v1198_v9 = vld [vmem:[%s2088_s1 + $0x20] sm:$0xff] }
 0xe0f   :  { %v740_v10 = vpop.permute.xlu1 %739 }
 0xe10   :  { %742 = vst.msk [vmem:[#allocation2 + $0x20] sm:$0xff] %vm328_vm2, %v740_v10  ;;  %1484 = vmatmul.mubr.msk.f32.vlgmr.msra.gmra.mrb[12].mxu0 %vm225_vm4, %v740_v10 }
 0xe11   :  { %743 = vst.msk [vmem:[#allocation2 + $0x18] sm:$0xff] %vm330_vm3, %v740_v10  ;;  %1588 = vmatpush3.bf16.msra.mxu0 %v1883_v13  ;;  %1505 = vmatprep.mubr.msk.f32.mxu0 %vm1778_vm0, %v1779_v1  ;;  %v1201_v10 = vld [vmem:[%s2088_s1 + $0x38] sm:$0xff] }
 0xe12   :  { %1589 = vmatprep.subr.bf16.mxu0 %v1777_v0 }
 0xe15   :  { %1591 = vmatpush3.bf16.msra.mxu0 %v1887_v19 }
 0xee3   :  { %v812_v11 = vpop.f32.mrb[12].mxu0 }
 0xee4   :  { %v816_v12 = vadd.f32 %v812_v11, %v1940_v37  ;;  %v1485_v14 = vpop.f32.mrb[13].mxu0  ;;  %v1200_v11 = vld [vmem:[%s2088_s1 + $0x30] sm:$0xff] }
 0xee6   :  { %1654 = vtanh.f32 %v816_v12  ;;  %v1310_v16 = vmul.f32 -1.442695, %v816_v12 }
 0xee8   :  { %1656 = vpow2.f32 %v1310_v16 }
 0xef0   :  { %v1655_v15 = vpop.eup %1654 }
 0xef1   :  { %826 = vrot.lane.b32.xlu0 %v1655_v15, %s1780_s4 }
 0xef2   :  { %v1657_v17 = vpop.eup %1656 }
 0xef3   :  { %v820_v18 = vadd.f32 1.0, %v1657_v17  ;;  %v1056_v17 = vld [vmem:[#allocation2 + $0x18] sm:$0xff] }
 0xef5   :  { %1658 = vrcp.f32 %v820_v18  ;;  %v1057_v18 = vld [vmem:[#allocation2 + $0x20] sm:$0xff] }
 0xeff   :  { %v1659_v13 = vpop.eup %1658 }
 0xf00   :  { %v824_v0 = vmul.f32 %v1659_v13, %v731_v7  ;;  %v1197_v7 = vld [vmem:[%s2088_s1 + $0x18] sm:$0xff] }
 0xf63   :  { %v827_v20 = vpop.permute.xlu0 %826 }
 0xf64   :  { %v829_v1 = vmul.f32 %v1659_v13, %v827_v20 }
 0xf66   :  { %831 = vrot.lane.b32.xlu1 %v829_v1, %s1780_s4 }
 0xfd8   :  { %v832_v19 = vpop.permute.xlu1 %831 }
 0xfd9   :  { %v834_v21 = vadd.f32 %v832_v19, %v824_v0 }
 0xfdb   :  { %1660 = vtanh.f32 %v834_v21 }
 0xfe5   :  { %v1661_v37 = vpop.eup %1660 }
 0xfe6   :  { %837 = vrot.lane.b32.xlu0 %v1661_v37, %s1780_s4 }
0x1058   :  { %v838_v22 = vpop.permute.xlu0 %837 }
0x1059   :  { %v840_v23 = vmul.f32 %v1659_v13, %v838_v22  ;;  %v1323_v22 = vld [vmem:[%s2093_s6] ss:$0 sm:$0xff]  ;;  %s1783_s6 = smov [#allocation9]  }
0x105a   :  { %s1278_s25 = sshll.u32 %s1783_s6, 4  ;;  %s1279_s25 = int_to_ptr.vmem [resolvable:$true] %s1278_s25 }
0x105b   :  { %842 = vrot.lane.b32.xlu1 %v840_v23, %s1781_s9  ;;  %s1744_s26 = scalar_lea.vmem %s1279_s25, 1024  ;;  %p1749_p11 = scmp.lt.s32.totalorder %s1279_s25, %s1279_s25 }
0x105c   :  { %p1745_p10 = scmp.ne.s32.totalorder %s1279_s25, %s1744_s26  ;;  %p1750_p12 = scmp.lt.s32.totalorder %s1744_s26, %s1744_s26 }
0x105e   :  { %p1751_p13 = por %p1750_p12, %p1749_p11 }
0x1060   :  { %p1752_p0 = pnand %p1751_p13, %p1745_p10 }
0x10cd   :  { %v843_v24 = vpop.permute.xlu1 %842 }
0x10ce   :  { %845 = vst.msk [vmem:[#allocation2 + $0x28] sm:$0xff] %vm328_vm2, %v843_v24  ;;  %1495 = vmatmul.mubr.msk.f32.vlgmr.msra.gmra.mrb[6].mxu1 %vm225_vm4, %v843_v24 }
0x10cf   :  { %846 = vst.msk [vmem:[#allocation2 + $0x10] sm:$0xff] %vm330_vm3, %v843_v24  ;;  %1595 = vmatpush3.bf16.msra.mxu1 %v1592_v60 }
0x10d0   :  { %1597 = vmatprep.subr.bf16.mxu1 %v1596_v63 }
0x10d3   :  { %1599 = vmatpush3.bf16.msra.mxu1 %v1596_v63 }
0x10d5   :  { %v1058_v13 = vld [vmem:[#allocation2 + $0x28] sm:$0xff] }
0x10d6   :  { %v1055_v16 = vld [vmem:[#allocation2 + $0x10] sm:$0xff] }
0x11a1   :  { %v915_v25 = vpop.f32.mrb[6].mxu1 }
0x11a2   :  { %v919_v26 = vadd.f32 %v915_v25, %v1946_v43  ;;  %v1496_v27 = vpop.f32.mrb[7].mxu1 }
0x11a4   :  { %1662 = vtanh.f32 %v919_v26  ;;  %v1312_v29 = vmul.f32 -1.442695, %v919_v26 }
0x11a6   :  { %1664 = vpow2.f32 %v1312_v29 }
0x11ae   :  { %v1663_v28 = vpop.eup %1662 }
0x11af   :  { %929 = vrot.lane.b32.xlu0 %v1663_v28, %s1780_s4 }
0x11b0   :  { %v1665_v30 = vpop.eup %1664 }
0x11b1   :  { %v923_v31 = vadd.f32 1.0, %v1665_v30 }
0x11b3   :  { %1666 = vrcp.f32 %v923_v31 }
0x11bd   :  { %v1667_v32 = vpop.eup %1666 }
0x11be   :  { %v927_v36 = vmul.f32 %v1667_v32, %v834_v21 }
0x1221   :  { %v930_v34 = vpop.permute.xlu0 %929 }
0x1222   :  { %v932_v35 = vmul.f32 %v1667_v32, %v930_v34 }
0x1224   :  { %934 = vrot.lane.b32.xlu1 %v932_v35, %s1780_s4 }
0x1296   :  { %v935_v38 = vpop.permute.xlu1 %934 }
0x1297   :  { %v937_v40 = vadd.f32 %v935_v38, %v927_v36 }
0x1299   :  { %1668 = vtanh.f32 %v937_v40 }
0x12a3   :  { %v1669_v43 = vpop.eup %1668 }
0x12a4   :  { %940 = vrot.lane.b32.xlu0 %v1669_v43, %s1780_s4 }
0x1316   :  { %v941_v42 = vpop.permute.xlu0 %940 }
0x1317   :  { %v943_v44 = vmul.f32 %v1667_v32, %v941_v42 }
0x1319   :  { %945 = vrot.lane.b32.xlu1 %v943_v44, %s1781_s9 }
0x138b   :  { %v946_v45 = vpop.permute.xlu1 %945 }
0x138c   :  { %948 = vst.msk [vmem:[#allocation2 + $0x30] sm:$0xff] %vm328_vm2, %v946_v45  ;;  %1506 = vmatmul.mubr.msk.f32.vlgmr.msra.gmra.mrb[14].mxu0 %vm225_vm4, %v946_v45 }
0x138d   :  { %949 = vst.msk [vmem:[#allocation2 + $0x8] sm:$0xff] %vm330_vm3, %v946_v45 }
0x1393   :  { %v1059_v20 = vld [vmem:[#allocation2 + $0x30] sm:$0xff] }
0x1394   :  { %v1054_v15 = vld [vmem:[#allocation2 + $0x8] sm:$0xff] }
0x145f   :  { %v1018_v46 = vpop.f32.mrb[14].mxu0 }
0x1460   :  { %v1022_v47 = vadd.f32 %v1018_v46, %v1944_v41  ;;  %v1507_v48 = vpop.f32.mrb[15].mxu0 }
0x1462   :  { %1670 = vtanh.f32 %v1022_v47  ;;  %v1314_v50 = vmul.f32 -1.442695, %v1022_v47 }
0x1464   :  { %1672 = vpow2.f32 %v1314_v50 }
0x146c   :  { %v1671_v49 = vpop.eup %1670 }
0x146d   :  { %1032 = vrot.lane.b32.xlu0 %v1671_v49, %s1780_s4 }
0x146e   :  { %v1673_v51 = vpop.eup %1672 }
0x146f   :  { %v1026_v52 = vadd.f32 1.0, %v1673_v51 }
0x1471   :  { %1674 = vrcp.f32 %v1026_v52 }
0x147b   :  { %v1675_v53 = vpop.eup %1674 }
0x147c   :  { %v1030_v55 = vmul.f32 %v1675_v53, %v937_v40 }
0x14df   :  { %v1033_v33 = vpop.permute.xlu0 %1032 }
0x14e0   :  { %v1035_v54 = vmul.f32 %v1675_v53, %v1033_v33 }
0x14e2   :  { %1037 = vrot.lane.b32.xlu1 %v1035_v54, %s1780_s4 }
0x1554   :  { %v1038_v56 = vpop.permute.xlu1 %1037 }
0x1555   :  { %v1040_v57 = vadd.f32 %v1038_v56, %v1030_v55 }
0x1557   :  { %1676 = vtanh.f32 %v1040_v57 }
0x1561   :  { %v1677_v41 = vpop.eup %1676 }
0x1562   :  { %1043 = vrot.lane.b32.xlu0 %v1677_v41, %s1780_s4 }
0x1566   :  { %1204 = vperm.xlu0 %1612, %v1194_v4  }
0x156a   :  { %1219 = vperm.xlu0 %1612, %v1197_v7  }
0x156e   :  { %1229 = vperm.xlu0 %1612, %v1199_v8  }
0x1572   :  { %1239 = vperm.xlu0 %1612, %v1201_v10  }
0x15d4   :  { %v1044_v2 = vpop.permute.xlu0 %1043 }
0x15d5   :  { %v1046_v3 = vmul.f32 %v1675_v53, %v1044_v2 }
0x15d7   :  { %1048 = vrot.lane.b32.xlu1 %v1046_v3, %s1781_s9 }
0x15db   :  { %1209 = vperm.xlu1 %1613, %v1195_v5  }
0x15df   :  { %1214 = vperm.xlu1 %1613, %v1196_v39  }
0x15e3   :  { %1224 = vperm.xlu1 %1613, %v1198_v9  }
0x15e5   :  { %v1205_v0 = vpop.permute.xlu0 %1204 }
0x15e7   :  { %1234 = vperm.xlu1 %1613, %v1200_v11  }
0x15e9   :  { %v1220_v21 = vpop.permute.xlu0 %1219 }
0x15ed   :  { %v1230_v32 = vpop.permute.xlu0 %1229 }
0x15f1   :  { %v1240_v46 = vpop.permute.xlu0 %1239 }
0x1649   :  { %v1049_v12 = vpop.permute.xlu1 %1048 }
0x164a   :  { %1051 = vst.msk [vmem:[#allocation2 + $0x38] sm:$0xff] %vm328_vm2, %v1049_v12 }
0x164b   :  { %1052 = vst.msk [vmem:[#allocation2] sm:$0xff] %vm330_vm3, %v1049_v12 }
0x1651   :  { %v1060_v1 = vld [vmem:[#allocation2 + $0x38] sm:$0xff] }
0x1652   :  { %v1053_v14 = vld [vmem:[#allocation2] sm:$0xff] }
0x1653   :  { %1516 = vmatprep.mubr.msk.f32.mxu1 %vm225_vm4, %v1053_v14 }
0x1654   :  { %1517 = vmatmul.mubr.msk.f32.vlgmr.msra.gmra.mrb[8].mxu1 %vm225_vm4, %v1054_v15 }
0x1655   :  { %1519 = vmatprep.mubr.msk.f32.mxu1 %vm225_vm4, %v1055_v16 }
0x1658   :  { %1520 = vmatmul.mubr.msk.f32.gmra.mrb[10].mxu1 %vm225_vm4, %v1056_v17 }
0x1659   :  { %1522 = vmatprep.mubr.msk.f32.mxu1 %vm225_vm4, %v1057_v18 }
0x165a   :  { %v1210_v19 = vpop.permute.xlu1 %1209 }
0x165c   :  { %1523 = vmatmul.mubr.msk.f32.gmra.mrb[12].mxu1 %vm225_vm4, %v1058_v13 }
0x165d   :  { %1525 = vmatprep.mubr.msk.f32.mxu1 %vm225_vm4, %v1059_v20 }
0x165e   :  { %v1215_v23 = vpop.permute.xlu1 %1214 }
0x1660   :  { %1526 = vmatmul.mubr.msk.f32.gmra.mrb[14].mxu1 %vm225_vm4, %v1060_v1 }
0x1662   :  { %v1225_v35 = vpop.permute.xlu1 %1224 }
0x1666   :  { %v1235_v49 = vpop.permute.xlu1 %1234 }
0x1727   :  { %v1518_v37 = vpop.f32.mrb[8].mxu1 }
0x1728   :  { %v1243_v24 = vmul.f32 %v1518_v37, %v1210_v19  ;;  %v1155_v25 = vpop.f32.mrb[9].mxu1 }
0x1729   :  { %v1242_v26 = vmul.f32 %v1205_v0, %v1155_v25 }
0x172a   :  { %v1258_v27 = vadd.f32 %v1323_v22, %v1243_v24 }
0x172b   :  { %v1257_v28 = vadd.f32 %v1323_v22, %v1242_v26  ;;  %v1521_v29 = vpop.f32.mrb[10].mxu1 }
0x172c   :  { %1266 = vst [vmem:[#allocation9 + $0x8] sm:$0xff] %v1258_v27  ;;  %v1245_v30 = vmul.f32 %v1521_v29, %v1220_v21  ;;  %v1165_v31 = vpop.f32.mrb[11].mxu1 }
0x172d   :  { %1265 = vst [vmem:[#allocation9] sm:$0xff] %v1257_v28  ;;  %v1244_v34 = vmul.f32 %v1215_v23, %v1165_v31 }
0x172e   :  { %v1260_v36 = vadd.f32 %v1323_v22, %v1245_v30 }
0x172f   :  { %v1259_v38 = vadd.f32 %v1323_v22, %v1244_v34  ;;  %v1524_v40 = vpop.f32.mrb[12].mxu1 }
0x1730   :  { %1268 = vst [vmem:[#allocation9 + $0x18] sm:$0xff] %v1260_v36  ;;  %v1247_v43 = vmul.f32 %v1524_v40, %v1230_v32  ;;  %v1175_v42 = vpop.f32.mrb[13].mxu1 }
0x1731   :  { %1267 = vst [vmem:[#allocation9 + $0x10] sm:$0xff] %v1259_v38  ;;  %v1246_v44 = vmul.f32 %v1225_v35, %v1175_v42 }
0x1732   :  { %v1262_v45 = vadd.f32 %v1323_v22, %v1247_v43 }
0x1733   :  { %v1261_v47 = vadd.f32 %v1323_v22, %v1246_v44  ;;  %v1527_v48 = vpop.f32.mrb[14].mxu1 }
0x1734   :  { %1270 = vst [vmem:[#allocation9 + $0x28] sm:$0xff] %v1262_v45  ;;  %v1249_v50 = vmul.f32 %v1527_v48, %v1240_v46  ;;  %v1185_v51 = vpop.f32.mrb[15].mxu1 }
0x1735   :  { %1269 = vst [vmem:[#allocation9 + $0x20] sm:$0xff] %v1261_v47  ;;  %v1248_v52 = vmul.f32 %v1235_v49, %v1185_v51 }
0x1736   :  { %v1264_v53 = vadd.f32 %v1323_v22, %v1249_v50 }
0x1737   :  { %v1263_v33 = vadd.f32 %v1323_v22, %v1248_v52 }
0x1738   :  { %1272 = vst [vmem:[#allocation9 + $0x38] sm:$0xff] %v1264_v53 }
0x1739   :  { %1271 = vst [vmem:[#allocation9 + $0x30] sm:$0xff] %v1263_v33 }
0x173a   :  { %1755 = shalt.err (!%p1752_p0)
}
0x173b   :  { %s1756_s30 = scalar_lea.hbm %s2094_s7, 1024 }
0x173c   :  { %p1757_p1 = scmp.ne.s32.totalorder %s2094_s7, %s1756_s30  ;;  %p1760_p2 = scmp.lt.u32.totalorder %s1756_s30, %s2094_s7 }
0x173e   :  { %p1762_p3 = pnand %p1760_p2, %p1757_p1 }
0x1740   :  { %1765 = shalt.err (!%p1762_p3)
}
0x1741   :  { %1284 = dma.vmem_to_hbm [thread:$0]  %s1279_s25, 1024, %s2094_s7, [#allocation5], %s1774_s13, %s1774_s13, %s1775_s14  }
0x1742   :  { %1770 = dma.done.wait [#allocation5], 1024  }
0x1743   :  { %1771 = vsyncadd [#allocation5], 4294966272 }
0x1744   :  { %1288 = vsyncpa [#allocation4], 1 }
0x1745   :  { %1289 = vsyncpa [#allocation7], 1 }
0x1746   :  { %1290 = vsyncpa [#allocation5], 1 }

</bundles_post_ra>
